<compile_context>
chip_gen: v7x
topology: tpu7x:2x2x1
jax: 0.10.0
libtpu: 0.0.40
codegen_flags: <defaults>
</compile_context>

<pallas_src>
import functools

import jax
import jax.numpy as jnp
from jax.experimental import pallas as pl
from jax.experimental.pallas import tpu as pltpu


def _layer_norm2d_kernel(w_ref, b_ref, x_ref, o_ref, *, eps):
    # x block: (bt, C, t_hw) -- channels on sublanes, flattened H*W lane-dense.
    x = x_ref[...].astype(jnp.float32)
    inv_c = 1.0 / x.shape[1]

    # One-pass statistics: sum(x) and sum(x*x) in a single traversal of the block.
    s1 = jnp.sum(x, axis=1, keepdims=True)                # (bt, 1, t_hw)
    s2 = jnp.sum(x * x, axis=1, keepdims=True)            # (bt, 1, t_hw)
    mean = s1 * inv_c
    var = jnp.maximum(s2 * inv_c - mean * mean, 0.0)      # biased var, clamp cancellation
    inv = jax.lax.rsqrt(var + eps)                        # EUP rsqrt

    w = w_ref[...].astype(jnp.float32)                    # (1, C, 1)
    b = b_ref[...].astype(jnp.float32)                    # (1, C, 1)

    o_ref[...] = ((x - mean) * inv * w + b).astype(o_ref.dtype)


def _round_up(n, m):
    return -(-n // m) * m


def _vmem_capacity_bytes():
    try:
        cap = getattr(pltpu.get_tpu_info(), "vmem_capacity_bytes", None)
        if cap:
            return int(cap)
    except Exception:
        pass
    return 128 * 1024 * 1024  # conservative default (v5e/v6e class parts)


def layer_norm2d(x, weight, bias, *, eps=1e-6):
    """x: (B, C, H, W); weight, bias: (C,). Returns (B, C, H, W), same as the PyTorch module."""
    B, C, H, W = x.shape
    HW = H * W
    x3 = x.reshape(B, C, HW)                               # lane-dense last dim

    itemsize = x.dtype.itemsize
    sublanes = {4: 8, 2: 16, 1: 32}.get(itemsize, 8)

    # ---- generation-aware VMEM budget -----------------------------------
    vmem_cap = _vmem_capacity_bytes()
    vmem_limit = min(64 * 1024 * 1024, int(vmem_cap * 0.7))   # ~64 MiB on 128 MiB parts, ~45 MiB on v7x
    # 2x in + 2x out double buffers (input dtype) + ~2 f32 block temporaries + headroom.
    f32_factor = 2 * (4 // itemsize)
    denom = 4 + f32_factor + 2
    tile_budget = max(1 << 20, min(8 << 20, vmem_limit // denom))

    # ---- tile selection with padded footprint ----------------------------
    c_pad = _round_up(C, sublanes)                         # sublane padding of the channel axis
    hw_pad = _round_up(HW, 128)                            # lane padding of the spatial axis
    per_batch = c_pad * hw_pad * itemsize                  # padded bytes of one (1, C, HW) slab

    if per_batch <= tile_budget:
        # Whole spatial extent per block; tile over batch.
        t_hw = HW
        bt = max(1, min(B, tile_budget // per_batch))
        if B >= 2:
            bt = min(bt, -(-B // 2))                       # >= 2 grid steps for v7x megacore
    else:
        # One batch per block; tile H*W into lane-dense multiples of 128.
        bt = 1
        lanes = (tile_budget // max(c_pad * itemsize, 1)) // 128 * 128
        t_hw = max(128, lanes)
        if t_hw >= HW:
            t_hw = HW                                      # full dim satisfies the (8,128) rule

    grid = (pl.cdiv(B, bt), pl.cdiv(HW, t_hw))             # ragged last blocks handled by Pallas

    w3 = weight.reshape(1, C, 1)
    b3 = bias.reshape(1, C, 1)

    kernel = functools.partial(_layer_norm2d_kernel, eps=float(eps))

    out = pl.pallas_call(
        kernel,
        out_shape=jax.ShapeDtypeStruct((B, C, HW), x.dtype),
        grid_spec=pltpu.PrefetchScalarGridSpec(
            num_scalar_prefetch=0,
            grid=grid,
            in_specs=[
                pl.BlockSpec((1, C, 1), lambda i, j: (0, 0, 0)),      # affine weight
                pl.BlockSpec((1, C, 1), lambda i, j: (0, 0, 0)),      # affine bias
                pl.BlockSpec((bt, C, t_hw), lambda i, j: (i, 0, j)),  # x
            ],
            out_specs=pl.BlockSpec((bt, C, t_hw), lambda i, j: (i, 0, j)),
        ),
        compiler_params=pltpu.CompilerParams(
            dimension_semantics=("parallel", "parallel"),             # megacore on v7x
            vmem_limit_bytes=vmem_limit,
        ),
    )(w3, b3, x3)
    return out.reshape(B, C, H, W)


def _reference(x, weight, bias, eps=1e-6):
    """Pure-JAX reference mirroring the PyTorch forward (rearrange + LayerNorm)."""
    xt = jnp.transpose(x, (0, 2, 3, 1)).astype(jnp.float32)           # b h w c
    mean = jnp.mean(xt, axis=-1, keepdims=True)
    var = jnp.mean((xt - mean) ** 2, axis=-1, keepdims=True)
    y = (xt - mean) / jnp.sqrt(var + eps)
    y = y * weight.astype(jnp.float32) + bias.astype(jnp.float32)
    return jnp.transpose(y, (0, 3, 1, 2)).astype(x.dtype)             # b c h w


if __name__ == "__main__":
    key = jax.random.PRNGKey(0)
    kx, kw, kb = jax.random.split(key, 3)

    B, C, H, W = 2, 4, 16, 16
    x = jax.random.normal(kx, (B, C, H, W), dtype=jnp.float32)

    # Affine parameters of nn.LayerNorm(C) (deterministic synthetic values).
    weight = 1.0 + 0.1 * jax.random.normal(kw, (C,), dtype=jnp.float32)
    bias = 0.1 * jax.random.normal(kb, (C,), dtype=jnp.float32)

    out = layer_norm2d(x, weight, bias, eps=1e-6)
    out = jax.block_until_ready(out)

    ref = _reference(x, weight, bias, eps=1e-6)
    assert out.shape == (B, C, H, W), out.shape
    assert jnp.allclose(out, ref, atol=2e-5, rtol=2e-5), \
        float(jnp.max(jnp.abs(out - ref)))

    print("KERNEL_OK")
</pallas_src>

<mosaic_0001>
module attributes {stable_mosaic.version = 11 : i64} {
  func.func @_layer_norm2d_kernel(%arg0: i32, %arg1: i32, %arg2: memref<1x4x1xf32, #tpu.memory_space<vmem>>, %arg3: memref<1x4x1xf32, #tpu.memory_space<vmem>>, %arg4: memref<1x4x256xf32, #tpu.memory_space<vmem>>, %arg5: memref<1x4x256xf32, #tpu.memory_space<vmem>>) attributes {dimension_semantics = [#tpu.dimension_semantics<parallel>, #tpu.dimension_semantics<parallel>], iteration_bounds = array<i64: 2, 1>, scalar_prefetch = 0 : i64, scratch_operands = 0 : i64, tpu.core_type = #tpu.core_type<tc>, window_params = [{pipeline_mode = #tpu.pipeline_mode<synchronous>, transform_indices = @transform_0, window_bounds = array<i64: 1, 4, 1>}, {pipeline_mode = #tpu.pipeline_mode<synchronous>, transform_indices = @transform_1, window_bounds = array<i64: 1, 4, 1>}, {transform_indices = @transform_2, window_bounds = array<i64: 1, 4, 256>}, {transform_indices = @transform_3, window_bounds = array<i64: 1, 4, 256>}]} {
    %c0 = arith.constant 0 : index
    %c0_0 = arith.constant 0 : index
    %c0_1 = arith.constant 0 : index
    %0 = vector.load %arg4[%c0, %c0_0, %c0_1] : memref<1x4x256xf32, #tpu.memory_space<vmem>>, vector<1x4x256xf32>
    %cst = arith.constant dense<0.000000e+00> : vector<1x256xf32>
    %1 = vector.multi_reduction <add>, %0, %cst [1] : vector<1x4x256xf32> to vector<1x256xf32>
    %2 = vector.shape_cast %1 : vector<1x256xf32> to vector<1x1x256xf32>
    %3 = arith.mulf %0, %0 : vector<1x4x256xf32>
    %cst_2 = arith.constant dense<0.000000e+00> : vector<1x256xf32>
    %4 = vector.multi_reduction <add>, %3, %cst_2 [1] : vector<1x4x256xf32> to vector<1x256xf32>
    %5 = vector.shape_cast %4 : vector<1x256xf32> to vector<1x1x256xf32>
    %cst_3 = arith.constant 2.500000e-01 : f32
    %6 = vector.broadcast %cst_3 : f32 to vector<1x1x256xf32>
    %7 = arith.mulf %2, %6 : vector<1x1x256xf32>
    %cst_4 = arith.constant 2.500000e-01 : f32
    %8 = vector.broadcast %cst_4 : f32 to vector<1x1x256xf32>
    %9 = arith.mulf %5, %8 : vector<1x1x256xf32>
    %10 = arith.mulf %7, %7 : vector<1x1x256xf32>
    %11 = arith.subf %9, %10 : vector<1x1x256xf32>
    %cst_5 = arith.constant 0.000000e+00 : f32
    %12 = vector.broadcast %cst_5 : f32 to vector<1x1x256xf32>
    %13 = arith.maximumf %11, %12 : vector<1x1x256xf32>
    %cst_6 = arith.constant 9.99999997E-7 : f32
    %14 = vector.broadcast %cst_6 : f32 to vector<1x1x256xf32>
    %15 = arith.addf %13, %14 : vector<1x1x256xf32>
    %16 = math.rsqrt %15 : vector<1x1x256xf32>
    %c0_7 = arith.constant 0 : index
    %c0_8 = arith.constant 0 : index
    %c0_9 = arith.constant 0 : index
    %17 = vector.load %arg2[%c0_7, %c0_8, %c0_9] : memref<1x4x1xf32, #tpu.memory_space<vmem>>, vector<1x4x1xf32>
    %c0_10 = arith.constant 0 : index
    %c0_11 = arith.constant 0 : index
    %c0_12 = arith.constant 0 : index
    %18 = vector.load %arg3[%c0_10, %c0_11, %c0_12] : memref<1x4x1xf32, #tpu.memory_space<vmem>>, vector<1x4x1xf32>
    %19 = vector.broadcast %7 : vector<1x1x256xf32> to vector<1x4x256xf32>
    %20 = arith.subf %0, %19 : vector<1x4x256xf32>
    %21 = vector.broadcast %16 : vector<1x1x256xf32> to vector<1x4x256xf32>
    %22 = arith.mulf %20, %21 : vector<1x4x256xf32>
    %23 = vector.broadcast %17 : vector<1x4x1xf32> to vector<1x4x256xf32>
    %24 = arith.mulf %22, %23 : vector<1x4x256xf32>
    %25 = vector.broadcast %18 : vector<1x4x1xf32> to vector<1x4x256xf32>
    %26 = arith.addf %24, %25 : vector<1x4x256xf32>
    %c0_13 = arith.constant 0 : index
    %c0_14 = arith.constant 0 : index
    %c0_15 = arith.constant 0 : index
    %27 = vector.load %arg5[%c0_13, %c0_14, %c0_15] : memref<1x4x256xf32, #tpu.memory_space<vmem>>, vector<1x4x256xf32>
    tpu.vector_store %arg5[%c0_13, %c0_14, %c0_15], %26 {strides = array<i32>} : memref<1x4x256xf32, #tpu.memory_space<vmem>>, vector<1x4x256xf32>,
    return
  }
  func.func @transform_0(%arg0: i32, %arg1: i32) -> (i32, i32, i32) {
    %c0_i32 = arith.constant 0 : i32
    %c0_i32_0 = arith.constant 0 : i32
    %c0_i32_1 = arith.constant 0 : i32
    %c0_i32_2 = arith.constant 0 : i32
    return %c0_i32, %c0_i32_0, %c0_i32_1 : i32, i32, i32
  }
  func.func @transform_1(%arg0: i32, %arg1: i32) -> (i32, i32, i32) {
    %c0_i32 = arith.constant 0 : i32
    %c0_i32_0 = arith.constant 0 : i32
    %c0_i32_1 = arith.constant 0 : i32
    %c0_i32_2 = arith.constant 0 : i32
    return %c0_i32, %c0_i32_0, %c0_i32_1 : i32, i32, i32
  }
  func.func @transform_2(%arg0: i32, %arg1: i32) -> (i32, i32, i32) {
    %c0_i32 = arith.constant 0 : i32
    %c0_i32_0 = arith.constant 0 : i32
    return %arg0, %c0_i32, %arg1 : i32, i32, i32
  }
  func.func @transform_3(%arg0: i32, %arg1: i32) -> (i32, i32, i32) {
    %c0_i32 = arith.constant 0 : i32
    %c0_i32_0 = arith.constant 0 : i32
    return %arg0, %c0_i32, %arg1 : i32, i32, i32
  }
}

</mosaic_0001>

<bundles_post_ra>
// kernel: tpu_custom_call.1
= control target key start
LH: loop header
LB: loop body
LE: loop exit
PB: predicated region body
PF: predicated region fallthrough
CT: control target
= control target key end

     0   :  { %8 = vsyncpa [#allocation3], 0  ;;  %s1002_s0 = inlined_call_operand.hbm [shape: f32[1,4,1], index: 0, kind: input, shape index: {}]   ;;  %s1003_s1 = inlined_call_operand.hbm [shape: f32[1,4,1], index: 1, kind: input, shape index: {}]   ;;  %s1004_s2 = inlined_call_operand.hbm [shape: f32[2,4,256], index: 2, kind: input, shape index: {}]   ;;  %s1005_s3 = inlined_call_operand.hbm [shape: f32[2,4,256], index: 3, kind: output, shape index: {}]  }
   0x1   :  { %9 = vsyncpa [#allocation6], 0 }
   0x2   :  { %10 = vsyncpa [#allocation4], 0 }
   0x3   :  { %12 = vsyncpa [#allocation4 + $0x1], 0  ;;  %s756_s12 = smov 0   ;;  %s758_s13 = smov 0  }
   0x4   :  { %s760_s14 = smov 0   ;;  %s762_s15 = smov 0  }
   0x5   :  { %s764_s16 = smov 0   ;;  %s766_s17 = smov 0  }
   0x6 LB: > { %s787_s18 = sadd.s32 4294967295, %s728_s17   ;;  %s441_s19 = sadd.s32 4294967294, %s728_s17   ;;  %s728_s17 = sphi %s766_s17, %s18_s17   ;;  %s724_s16 = sphi %s764_s16, %s1028_s16   ;;  %s720_s15 = sphi %s762_s15, %s1027_s15   ;;  %s716_s14 = sphi %s760_s14, %s1026_s14   ;;  %s712_s13 = sphi %s758_s13, %s1025_s13   ;;  %s708_s12 = sphi %s756_s12, %s1024_s12  }
   0x7   : > { %p94_p0 = scmp.ne.s32.totalorder %s712_s13, %s708_s12  ;;  %p1006_p1 = scmp.eq.s32.totalorder %s787_s18, 0 }
   0x8   : > { %p126_p3 = scmp.eq.s32.totalorder %s441_s19, 1  ;;  %p442_p5 = scmp.ge.s32.totalorder %s728_s17, 1 }
   0x9   : > { %p796_p4 = por %p1006_p1, %p94_p0  ;;  %p133_p7 = scmp.lt.s32.totalorder %s728_s17, 3 }
   0xa   : > { %p801_p6 = por %p126_p3, %p94_p0  ;;  %s730_s23 = smov [#allocation2]  }
   0xb   : > { %s1009_s20 = scalar_select %p796_p4, 1, 0 }
   0xc   : > { %s1010_s21 = scalar_select %p801_p6, 1, 0 }
   0xd   : > { %p806_p8 = pnand %p442_p5, %p133_p7  ;;  %s146_s24 = sshll.u32 %s730_s23, 4  ;;  %s147_s24 = int_to_ptr.vmem [resolvable:$true] %s146_s24 }
   0xe   : > { %s731_s25 = smov [#allocation5]   ;;  %s552_s30 = scalar_lea.hbm %s1002_s0, 64 }
   0xf   : > { %s1011_s22 = scalar_select %p806_p8, 1, 0 }
  0x10   : > { %p473_p10 = pneg %p806_p8  ;;  %s157_s26 = sshll.u32 %s731_s25, 4  ;;  %s819_s26 = int_to_ptr.vmem [resolvable:$true] %s157_s26 }
  0x11   : > { %p553_p12 = scmp.ne.s32.totalorder %s1002_s0, %s552_s30  ;;  %p559_p5 = scmp.lt.u32.totalorder %s552_s30, %s1002_s0 }
  0x12   : > { %p815_p11 = pnand %p473_p10, %p1006_p1 }
  0x14   : > { %p554_p13 = pneg %p815_p11 }
  0x16   : > { %p555_p0 = pnand %p554_p13, %p553_p12 }
  0x18   : > { %p556_p3 = pneg %p555_p0 }
  0x1a   : > { %p561_p7 = pnand %p559_p5, %p556_p3 }
  0x1c   : > { %564 = shalt.err (!%p561_p7)
}
  0x1d   : > { %s565_s8 = scalar_lea.vmem %s147_s24, 64  ;;  %p573_p2 = scmp.lt.s32.totalorder %s147_s24, %s147_s24 }
  0x1e   : > { %p566_p10 = scmp.ne.s32.totalorder %s147_s24, %s565_s8  ;;  %p574_p6 = scmp.lt.s32.totalorder %s565_s8, %s565_s8 }
  0x20   : > { %p568_p9 = pnand %p566_p10, %p554_p13  ;;  %p575_p4 = por %p574_p6, %p573_p2 }
  0x22   : > { %p569_p1 = pneg %p568_p9 }
  0x24   : > { %p576_p8 = pnand %p575_p4, %p569_p1 }
  0x26   : > { %579 = shalt.err (!%p576_p8)
}
  0x27   : > { %476 = dma.hbm_to_vmem [thread:$0]  (!%p815_p11), %s1002_s0, 64, %s147_s24, [#allocation3]  }
  0x28   : > { %s580_s23 = scalar_lea.hbm %s1003_s1, 64 }
  0x29   : > { %p581_p9 = scmp.ne.s32.totalorder %s1003_s1, %s580_s23  ;;  %p587_p4 = scmp.lt.u32.totalorder %s580_s23, %s1003_s1 }
  0x2b   : > { %p583_p2 = pnand %p581_p9, %p554_p13 }
  0x2d   : > { %p584_p1 = pneg %p583_p2 }
  0x2f   : > { %p589_p6 = pnand %p587_p4, %p584_p1 }
  0x31   : > { %592 = shalt.err (!%p589_p6)
}
  0x32   : > { %s593_s24 = scalar_lea.vmem %s819_s26, 64  ;;  %p601_p3 = scmp.lt.s32.totalorder %s819_s26, %s819_s26 }
  0x33   : > { %p594_p8 = scmp.ne.s32.totalorder %s819_s26, %s593_s24  ;;  %p602_p5 = scmp.lt.s32.totalorder %s593_s24, %s593_s24 }
  0x35   : > { %p596_p12 = pnand %p594_p8, %p554_p13  ;;  %p603_p7 = por %p602_p5, %p601_p3 }
  0x37   : > { %p597_p0 = pneg %p596_p12 }
  0x39   : > { %p604_p10 = pnand %p603_p7, %p597_p0 }
  0x3b   : > { %607 = shalt.err (!%p604_p10)
}
  0x3c   : > { %479 = dma.hbm_to_vmem [thread:$0]  (!%p815_p11), %s1003_s1, 64, %s819_s26, [#allocation6]  }
  0x3d   : > { %s30_s6 = sadd.s32 1, %s724_s16  ;;  %s81_s7 = sadd.s32 1, %s716_s14 }
  0x3e   : > { %p32_p13 = scmp.ge.s32.totalorder %s30_s6, 2  ;;  %p88_p9 = scmp.ne.s32.totalorder %s716_s14, %s712_s13 }
  0x3f   : > { %p89_p2 = scmp.eq.s32.totalorder %s728_s17, 0  ;;  %p490_p1 = scmp.lt.s32.totalorder %s728_s17, 2 }
  0x40   : > { %s1030_s6 = smov (%p32_p13, %s30_s6), 0  ;;  %p1013_p6 = scmp.eq.s32.totalorder %s787_s18, 1 }
  0x41   : > { %p90_p4 = por %p89_p2, %p88_p9  ;;  %s76_s8 = ssub.s32 %s724_s16, %s1030_s6 }
  0x42   : > { %p878_p8 = por %p1013_p6, %p88_p9  ;;  %s168_s9 = sand.u32 1, %s728_s17  }
  0x43   : > { %p79_p12 = scmp.eq.s32.totalorder %s76_s8, 0  ;;  %s170_s10 = sand.u32 1, %s716_s14  }
  0x44   : > { %s459_s26 = sshll.u32 %s724_s16, 7  ;;  %s446_s19 = sshll.u32 %s170_s10, 3 }
  0x45   : > { %s888_s11 = scalar_select %p79_p12, %s716_s14, %s81_s7  }
  0x46   : > { %s893_s28 = scalar_lea.hbm %s1004_s2, %s459_s26  ;;  %p895_p11 = pnand %p490_p1, %p90_p4 }
  0x47   : > { %s172_s30 = scalar_lea.vmem [#allocation7], %s446_s19  ;;  %s169_s4 = scalar_lea.sflag [#allocation3], %s168_s9 }
  0x48   : > { %s182_s24 = sshll.u32 %s172_s30, 4  ;;  %s608_s5 = scalar_lea.hbm %s893_s28, 128  ;;  %s899_s24 = int_to_ptr.vmem [resolvable:$true] %s182_s24 }
  0x49   : > { %p609_p0 = scmp.ne.s32.totalorder %s893_s28, %s608_s5  ;;  %p610_p3 = pneg %p895_p11 }
  0x4a   : > { %s613_s10 = scalar_lea.hbm %s1004_s2, 256  ;;  %p614_p10 = scmp.lt.u32.totalorder %s893_s28, %s1004_s2 }
  0x4b   : > { %p611_p5 = pnand %p610_p3, %p609_p0  ;;  %p615_p13 = scmp.lt.u32.totalorder %s613_s10, %s608_s5 }
  0x4c   : > { %p617_p2 = scmp.lt.u32.totalorder %s608_s5, %s893_s28 }
  0x4d   : > { %p612_p7 = pneg %p611_p5  ;;  %p616_p9 = por %p615_p13, %p614_p10 }
  0x4f   : > { %p618_p1 = por %p617_p2, %p616_p9 }
  0x51   : > { %p619_p4 = pnand %p618_p1, %p612_p7 }
  0x53   : > { %622 = shalt.err (!%p619_p4)
}
  0x54   : > { %s623_s9 = scalar_lea.vmem %s899_s24, 128  ;;  %s732_s19 = smov [#allocation7]  }
  0x55   : > { %p624_p6 = scmp.ne.s32.totalorder %s899_s24, %s623_s9  ;;  %s628_s25 = sshll.u32 %s732_s19, 4  ;;  %s629_s25 = int_to_ptr.vmem [resolvable:$false] %s628_s25 }
  0x56   : > { %s630_s30 = scalar_lea.vmem %s629_s25, 256  ;;  %p631_p5 = scmp.lt.s32.totalorder %s899_s24, %s629_s25 }
  0x57   : > { %p626_p12 = pnand %p624_p6, %p610_p3  ;;  %p632_p10 = scmp.lt.s32.totalorder %s630_s30, %s623_s9 }
  0x59   : > { %p627_p0 = pneg %p626_p12  ;;  %p633_p13 = por %p632_p10, %p631_p5 }
  0x5b   : > { %p634_p9 = pnand %p633_p13, %p627_p0 }
  0x5d   : > { %637 = shalt.err (!%p634_p9)
}
  0x5e   : > { %483 = dma.hbm_to_vmem [thread:$0]  (!%p895_p11), %s893_s28, 128, %s899_s24, %s169_s4  }
  0x5f   : > { %p1016_p7 = scmp.ne.s32.totalorder %s1011_s22, 0 }
  0x60   : > { %p1017_p3 = scmp.eq.s32.totalorder (!%p1016_p7), %s787_s18, 0 }
  0x61   : > { %191 = sbr.rel (%p1016_p7) target bundleno = 266 (0x10a), region = 32 }
  0x68   : > { %691 = dma.done.wait (%p1017_p3), [#allocation3], 64   ;;  %p1018_p2 = pmov %p1017_p3 }
  0x6a   : > { %693 = vsyncadd (%p1018_p2), [#allocation3], 4294967232  ;;  %p1019_p1 = pmov %p1018_p2 }
  0x6c   : > { %695 = dma.done.wait (%p1019_p1), [#allocation6], 64   ;;  %p1020_p4 = pmov %p1019_p1 }
  0x6d   : > { %s201_s28 = sand.u32 1, %s787_s18   ;;  %s203_s29 = sand.u32 1, %s712_s13  }
  0x6e   : > { %697 = vsyncadd (%p1020_p4), [#allocation6], 4294967232  ;;  %s940_s22 = sshll.u32 %s203_s29, 3  ;;  %s202_s24 = scalar_lea.sflag [#allocation3], %s201_s28 }
  0x6f   : > { %s205_s4 = scalar_lea.vmem [#allocation7], %s940_s22  ;;  %p1021_p11 = scmp.ne.s32.totalorder %s1009_s20, 0 }
  0x71   : > { %699 = dma.done.wait (%p1021_p11), %s202_s24, 128  }
  0x72   : > { %701 = vsyncadd (%p1021_p11), %s202_s24, 4294967168  ;;  %v733_v0 = vmov 0   ;;  %v281_v1 = vld [vmem:[#allocation2] sm:$0xf]  ;;  %v282_v2 = vld [vmem:[#allocation5] sm:$0xf]  ;;  %v300_v49 = vlaneseq }
  0x73   : > { %546 = vset.pattern.permute.xlu0 %v733_v0  ;;  %v230_v3 = vld [vmem:[%s205_s4] sm:$0xff]  ;;  %vm234_vm0 = vcmask 1043456   ;;  %v734_v47 = vmov 839922192   ;;  %s460_s18 = sshll.u32 %s720_s15, 7  ;;  %s227_s20 = scalar_lea.vmem [#allocation8], %s940_s22 }
  0x74   : > { %295 = vperm.xlu0 %546, %v281_v1   ;;  %v232_v4 = vcombine.high %v230_v3, %v230_v3  ;;  %v249_v5 = vmul.f32 %v230_v3, %v230_v3  ;;  %v235_v6 = vsel %vm234_vm0, %v230_v3, 0.0  ;;  %v298_v48 = vunpack.c.l.s4 %v734_v47  ;;  %s337_s5 = sshll.u32 %s227_s20, 4  ;;  %s952_s10 = scalar_lea.hbm %s1005_s3, %s460_s18  ;;  %s954_s5 = int_to_ptr.vmem [resolvable:$true] %s337_s5 }
  0x75   : > { %v236_v9 = vrot.slane %v235_v6, 4  ;;  %v301_v52 = vshrl.u32 %v300_v49, 7  ;;  %s321_s26 = scalar_lea.sflag [#allocation4], %s203_s29  ;;  %s638_s23 = scalar_lea.vmem %s954_s5, 128 }
  0x76   : > { %v242_v7 = vsel %vm234_vm0, %v232_v4, 0.0  ;;  %v251_v8 = vcombine.high %v249_v5, %v249_v5  ;;  %v253_v11 = vsel %vm234_vm0, %v249_v5, 0.0  ;;  %v299_v51 = vunpack.c.0.s8 %v298_v48  ;;  %p639_p6 = scmp.ne.s32.totalorder %s954_s5, %s638_s23  ;;  %s735_s15 = smov [#allocation8]  }
  0x77   : > { %v243_v10 = vrot.slane %v242_v7, 4  ;;  %v237_v13 = vadd.f32 %v236_v9, %v235_v6  ;;  %v254_v14 = vrot.slane %v253_v11, 4  ;;  %s642_s9 = sshll.u32 %s735_s15, 4  ;;  %s643_s9 = int_to_ptr.vmem [resolvable:$false] %s642_s9 }
  0x78   : > { %308 = vperm.xlu0 %546, %v282_v2   ;;  %v260_v12 = vsel %vm234_vm0, %v251_v8, 0.0  ;;  %v302_v55 = vsub.s32 %v299_v51, %v301_v52  ;;  %p640_p12 = pnand %p639_p6, %p878_p8  ;;  %s644_s19 = scalar_lea.vmem %s643_s9, 256 }
  0x79   : > { %v244_v15 = vadd.f32 %v243_v10, %v242_v7  ;;  %v261_v16 = vrot.slane %v260_v12, 4  ;;  %v238_v17 = vrot.slane %v237_v13, 2  ;;  %v255_v18 = vadd.f32 %v254_v14, %v253_v11  ;;  %p645_p5 = scmp.lt.s32.totalorder %s954_s5, %s643_s9  ;;  %p646_p10 = scmp.lt.s32.totalorder %s644_s19, %s638_s23 }
  0x7a   : > { %p641_p0 = pneg %p640_p12 }
  0x7b   : > { %v245_v19 = vrot.slane %v244_v15, 2  ;;  %v262_v20 = vadd.f32 %v261_v16, %v260_v12  ;;  %v239_v21 = vadd.f32 %v238_v17, %v237_v13  ;;  %v256_v22 = vrot.slane %v255_v18, 2  ;;  %p647_p13 = por %p646_p10, %p645_p5 }
  0x7d   : > { %v246_v23 = vadd.f32 %v245_v19, %v244_v15  ;;  %v263_v24 = vrot.slane %v262_v20, 2  ;;  %v240_v25 = vrot.slane %v239_v21, 1  ;;  %v257_v26 = vadd.f32 %v256_v22, %v255_v18  ;;  %p648_p9 = pnand %p647_p13, %p641_p0 }
  0x7f   : > { %v247_v27 = vrot.slane %v246_v23, 1  ;;  %v264_v28 = vadd.f32 %v263_v24, %v262_v20  ;;  %v241_v29 = vadd.f32 %v240_v25, %v239_v21  ;;  %v258_v30 = vrot.slane %v257_v26, 1 }
  0x81   : > { %v248_v31 = vadd.f32 %v247_v27, %v246_v23  ;;  %v265_v32 = vrot.slane %v264_v28, 1  ;;  %v259_v33 = vadd.f32 %v258_v30, %v257_v26  ;;  %v267_v34 = vmul.f32 0.25, %v241_v29 }
  0x83   : > { %v266_v35 = vadd.f32 %v265_v32, %v264_v28  ;;  %v268_v36 = vmul.f32 0.25, %v248_v31  ;;  %v269_v37 = vmul.f32 0.25, %v259_v33  ;;  %v271_v38 = vmul.f32 %v267_v34, %v267_v34 }
  0x85   : > { %v270_v39 = vmul.f32 0.25, %v266_v35  ;;  %v272_v40 = vmul.f32 %v268_v36, %v268_v36  ;;  %v273_v41 = vsub.f32 %v269_v37, %v271_v38  ;;  %v285_v53 = vcombine.low %v267_v34, %v268_v36 }
  0x87   : > { %v274_v42 = vsub.f32 %v270_v39, %v272_v40  ;;  %v275_v43 = vmax.f32 %v273_v41, 0.0  ;;  %v287_v56 = vsub.f32 %v230_v3, %v285_v53 }
  0x89   : > { %v276_v44 = vmax.f32 %v274_v42, 0.0  ;;  %v277_v45 = vadd.f32 1e-06, %v275_v43 }
  0x8b   : > { %v278_v46 = vadd.f32 1e-06, %v276_v44  ;;  %548 = vrsqrt.f32 %v277_v45 }
  0x8d   : > { %550 = vrsqrt.f32 %v278_v46 }
  0x95   : > { %v549_v50 = vpop.eup %548 }
  0x97   : > { %v551_v54 = vpop.eup %550 }
  0x98   : > { %v290_v57 = vcombine.low %v549_v50, %v551_v54 }
  0x9a   : > { %v292_v59 = vmul.f32 %v290_v57, %v287_v56 }
  0xf3   : > { %v296_v58 = vpop.permute.xlu0 %295 }
  0xf4   : > { %v303_v60 = vrot.slane %v296_v58, %v302_v55 }
  0xf6   : > { %v305_v62 = vmul.f32 %v303_v60, %v292_v59 }
  0xf7   : > { %v309_v61 = vpop.permute.xlu0 %308 }
  0xf8   : > { %v316_v63 = vrot.slane %v309_v61, %v302_v55 }
  0xfa   : > { %v318_v0 = vadd.f32 %v316_v63, %v305_v62 }
  0xfc   : > { %319 = vst [vmem:[%s227_s20] sm:$0xff] %v318_v0 }
  0xfd   : > { %651 = shalt.err (!%p648_p9)
}
  0xfe   : > { %s652_s25 = scalar_lea.hbm %s952_s10, 128  ;;  %s656_s29 = scalar_lea.hbm %s1005_s3, 256 }
  0xff   : > { %p653_p7 = scmp.ne.s32.totalorder %s952_s10, %s652_s25  ;;  %p657_p1 = scmp.lt.u32.totalorder %s952_s10, %s1005_s3 }
 0x100   : > { %p658_p4 = scmp.lt.u32.totalorder %s656_s29, %s652_s25  ;;  %p660_p6 = scmp.lt.u32.totalorder %s652_s25, %s952_s10 }
 0x101   : > { %p654_p3 = pnand %p653_p7, %p878_p8 }
 0x102   : > { %p659_p11 = por %p658_p4, %p657_p1 }
 0x103   : > { %p655_p2 = pneg %p654_p3 }
 0x104   : > { %p661_p12 = por %p660_p6, %p659_p11 }
 0x106   : > { %p662_p0 = pnand %p661_p12, %p655_p2 }
 0x108   : > { %665 = shalt.err (!%p662_p0)
}
 0x109   : > { %471 = dma.vmem_to_hbm [thread:$0]  (%p878_p8), %s954_s5, 128, %s952_s10, %s321_s26  }
 0x10a PF: > { %s349_s4 = sand.u32 1, %s708_s12   ;;  %p1022_p5 = scmp.ne.s32.totalorder %s1010_s21, 0 }
 0x10b   : > { %p1023_p10 = scmp.ge.s32.totalorder %s728_s17, 2  ;;  %s350_s18 = scalar_lea.sflag [#allocation4], %s349_s4 }
 0x10d   : > { %p485_p13 = pnand %p1023_p10, %p1022_p5 }
 0x10f   : > { %703 = dma.done.wait (!%p485_p13), %s350_s18, 128  }
 0x110   : > { %705 = vsyncadd (!%p485_p13), %s350_s18, 4294967168  ;;  %s18_s17 = sadd.s32 1, %s728_s17   ;;  %s1024_s12 = smov %s712_s13 }
 0x111   : > { %p15_p9 = scmp.ge.s32.totalorder %s18_s17, 4   ;;  %s1025_s13 = smov %s716_s14 }
 0x112   : > { %s1026_s14 = smov %s888_s11  ;;  %s1027_s15 = smov %s724_s16 }
 0x113   : > { %s1028_s16 = smov %s1030_s6  ;;  %17 = sbr.rel (!%p15_p9) target bundleno = 6 (0x6), region = 84 }
 0x11a   :  { %355 = vsyncpa [#allocation3], 1 }
 0x11b   :  { %357 = vsyncpa [#allocation3 + $0x1], 1 }
 0x11c   :  { %358 = vsyncpa [#allocation6], 1 }
 0x11d   :  { %359 = vsyncpa [#allocation4], 1 }
 0x11e   :  { %361 = vsyncpa [#allocation4 + $0x1], 1 }

</bundles_post_ra>
